<compile_context>
chip_gen: v5e
topology: v5e:2x2
jax: 0.10.0
libtpu: 0.0.40
codegen_flags: <defaults>
</compile_context>

<pallas_src>
import functools

import jax
import jax.numpy as jnp
from jax.experimental import pallas as pl
from jax.experimental.pallas import tpu as pltpu

_LANE = 128
_SUBLANE = 8


def _round_up(x, m):
    return ((x + m - 1) // m) * m


def _multilabel_fused_kernel(x_ref, w_ref, b_ref, o_ref, *, compute_dtype):
    """One batch tile, full reduction in one shot: no accumulator needed."""
    logits = jnp.dot(
        x_ref[...].astype(compute_dtype),
        w_ref[...],                                   # [F, L_pad], already compute dtype
        preferred_element_type=jnp.float32,
    ) + b_ref[...]                                    # [1, L_pad] broadcasts over rows
    e = jnp.exp(-logits)                              # EUP transcendental
    # Exact reciprocal keeps 1e-5 parity with jax.nn.sigmoid; flip to
    # approx=True (EUP vrcp) once the tolerance budget allows.
    o_ref[...] = pl.reciprocal(1.0 + e, approx=False).astype(o_ref.dtype)


def _multilabel_tiled_kernel(x_ref, w_ref, b_ref, o_ref, acc_ref, *, compute_dtype):
    """Batch x K grid; bias folded into the k == 0 accumulator init."""
    k = pl.program_id(1)

    @pl.when(k == 0)
    def _():
        acc_ref[...] = jnp.broadcast_to(b_ref[...].astype(jnp.float32), acc_ref.shape)

    acc_ref[...] += jnp.dot(
        x_ref[...].astype(compute_dtype),
        w_ref[...],                                   # [tk, L_pad] canonical [K, N]
        preferred_element_type=jnp.float32,
    )

    @pl.when(k == pl.num_programs(1) - 1)
    def _():
        e = jnp.exp(-acc_ref[...])
        o_ref[...] = pl.reciprocal(1.0 + e, approx=False).astype(o_ref.dtype)


class MultiLabelModelPallas:
    """Pallas port of `MultiLabelModel`: y = sigmoid(x @ W.T + b)."""

    # Below this much matmul work, pallas_call/grid-step overhead dominates.
    _MIN_PALLAS_WORK = 1 << 18

    def __init__(self, weight, bias, *, compute_dtype=jnp.float32,
                 out_dtype=jnp.float32):
        # weight: [L, F] (torch nn.Linear layout), bias: [L].
        self.num_labels, self.num_features = weight.shape
        self.compute_dtype = compute_dtype
        self.out_dtype = out_dtype

        l_pad = _round_up(max(self.num_labels, _LANE), _LANE)
        self.l_pad = l_pad
        # Pad + transpose ONCE at init: [F, L_pad] ([K, N]) in the compute dtype.
        self.w_t_pad = (
            jnp.zeros((self.num_features, l_pad), dtype=compute_dtype)
            .at[:, : self.num_labels].set(weight.T.astype(compute_dtype))
        )
        self.b_pad = (
            jnp.zeros((1, l_pad), jnp.float32)
            .at[0, : self.num_labels].set(bias.astype(jnp.float32))
        )
        self._weight = weight
        self._bias = bias

        # Per-generation VMEM budget (~70% of physical); conservative v7x
        # fallback (64 MiB) if the hardware query is unavailable.
        try:
            vmem_cap = int(pltpu.get_tpu_info().vmem_capacity_bytes)
        except Exception:
            vmem_cap = 64 << 20
        self._vmem_budget = int(0.70 * vmem_cap)
        # v5e/v6e (128 MiB VMEM) can take bigger batch tiles than v7x (64 MiB).
        self._tm_cap = 1024 if vmem_cap >= (100 << 20) else 512

    # ------------------------------------------------------------------ dispatch
    def __call__(self, x, *, use_pallas=None):
        b, f = x.shape
        assert f == self.num_features
        if use_pallas is None:
            use_pallas = b * f * self.num_labels >= self._MIN_PALLAS_WORK
        if not use_pallas:
            # Tiny shapes: let XLA fuse matmul + sigmoid (no kernel-launch cost).
            return jax.nn.sigmoid(x @ self._weight.T + self._bias).astype(self.out_dtype)
        return self._pallas_forward(x)

    # -------------------------------------------------------------- tile helpers
    @staticmethod
    def _bytes(n, dtype):
        return int(n) * jnp.dtype(dtype).itemsize

    def _pick_tm(self, B):
        if B <= _SUBLANE:
            return B
        if B >= 2 * _SUBLANE:
            # >= 2 batch blocks so the "parallel" axis can shard across both
            # v7x TensorCores (harmless on single-TC v5e/v6e).
            return int(min(self._tm_cap, _round_up(pl.cdiv(B, 2), _SUBLANE)))
        return int(min(self._tm_cap, _round_up(B, _SUBLANE)))

    def _fused_footprint(self, tm, F, L_pad, x_dtype):
        # Double-buffered x / out tiles; weight counted 2x conservatively.
        return (2 * self._bytes(tm * F, x_dtype)
                + 2 * self._bytes(F * L_pad, self.compute_dtype)
                + self._bytes(L_pad, jnp.float32)
                + 2 * self._bytes(tm * L_pad, self.out_dtype))

    def _tiled_footprint(self, tm, tk, L_pad, x_dtype):
        return (2 * self._bytes(tm * tk, x_dtype)
                + 2 * self._bytes(tk * L_pad, self.compute_dtype)
                + self._bytes(L_pad, jnp.float32)
                + 2 * self._bytes(tm * L_pad, self.out_dtype)
                + self._bytes(tm * L_pad, jnp.float32))        # f32 accumulator

    # -------------------------------------------------------------- pallas paths
    def _pallas_forward(self, x):
        B, F = x.shape
        L_pad = self.l_pad
        budget = self._vmem_budget

        # Fused path: whole weight VMEM-resident, 1-D grid over batch.
        tm = self._pick_tm(B)
        while tm > _SUBLANE and self._fused_footprint(tm, F, L_pad, x.dtype) > budget:
            # For huge L_pad the [tm, L_pad] output slab dominates; shrink tm.
            tm = max(_SUBLANE, _round_up(tm // 2, _SUBLANE))
        if self._fused_footprint(tm, F, L_pad, x.dtype) <= budget:
            return self._call_fused(x, tm)

        # Tiled path: weight alone exceeds the budget, stream K blocks.
        # tk must divide F exactly -- a partial K block would accumulate
        # undefined padding into the reduction.
        for cand in (2048, 1024, 512, 256, 128):
            if F % cand != 0:
                continue
            tm = self._pick_tm(B)
            while tm > _SUBLANE and self._tiled_footprint(tm, cand, L_pad, x.dtype) > budget:
                tm = max(_SUBLANE, _round_up(tm // 2, _SUBLANE))
            if self._tiled_footprint(tm, cand, L_pad, x.dtype) <= budget:
                return self._call_tiled(x, tm, cand)
        # No 128-multiple divisor of F fits: keep the whole K axis (correct,
        # may over-provision VMEM for pathological shapes).
        # TODO(synk): zero-pad the feature axis of x and w to a 128-multiple
        # at call time (and/or add an N grid dim for very large L_pad).
        return self._call_tiled(x, self._pick_tm(B), F)

    def _call_fused(self, x, tm):
        B, F = x.shape
        L_pad = self.l_pad
        est = self._fused_footprint(tm, F, L_pad, x.dtype)
        vmem_limit = int(min(self._vmem_budget, max(est + est // 4, 32 << 20)))

        kernel = functools.partial(_multilabel_fused_kernel,
                                   compute_dtype=self.compute_dtype)
        out_pad = pl.pallas_call(
            kernel,
            out_shape=jax.ShapeDtypeStruct((B, L_pad), self.out_dtype),
            grid_spec=pltpu.PrefetchScalarGridSpec(
                num_scalar_prefetch=0,
                grid=(pl.cdiv(B, tm),),
                in_specs=[
                    pl.BlockSpec((tm, F), lambda i: (i, 0)),      # x batch tile
                    pl.BlockSpec((F, L_pad), lambda i: (0, 0)),   # weight, VMEM resident
                    pl.BlockSpec((1, L_pad), lambda i: (0, 0)),   # bias, resident
                ],
                out_specs=pl.BlockSpec((tm, L_pad), lambda i: (i, 0)),
            ),
            compiler_params=pltpu.CompilerParams(
                dimension_semantics=("parallel",),
                vmem_limit_bytes=vmem_limit,
            ),
        )(x, self.w_t_pad, self.b_pad)
        # Drop lane padding (padded columns hold sigmoid(0)=0.5).
        return out_pad[:, : self.num_labels]

    def _call_tiled(self, x, tm, tk):
        B, F = x.shape
        L_pad = self.l_pad
        est = self._tiled_footprint(tm, tk, L_pad, x.dtype)
        vmem_limit = int(min(max(self._vmem_budget, est + est // 4),
                             max(est + est // 4, 32 << 20)))

        kernel = functools.partial(_multilabel_tiled_kernel,
                                   compute_dtype=self.compute_dtype)
        out_pad = pl.pallas_call(
            kernel,
            out_shape=jax.ShapeDtypeStruct((B, L_pad), self.out_dtype),
            grid_spec=pltpu.PrefetchScalarGridSpec(
                num_scalar_prefetch=0,
                grid=(pl.cdiv(B, tm), pl.cdiv(F, tk)),
                in_specs=[
                    pl.BlockSpec((tm, tk), lambda i, k: (i, k)),      # x tile
                    pl.BlockSpec((tk, L_pad), lambda i, k: (k, 0)),   # weight [K, N]
                    pl.BlockSpec((1, L_pad), lambda i, k: (0, 0)),    # bias, resident
                ],
                out_specs=pl.BlockSpec((tm, L_pad), lambda i, k: (i, 0)),
                scratch_shapes=[pltpu.VMEM((tm, L_pad), jnp.float32)],
            ),
            compiler_params=pltpu.CompilerParams(
                dimension_semantics=("parallel", "arbitrary"),
                vmem_limit_bytes=vmem_limit,
            ),
        )(x, self.w_t_pad, self.b_pad)
        return out_pad[:, : self.num_labels]


def reference_forward(x, weight, bias):
    return jax.nn.sigmoid(x @ weight.T + bias)


if __name__ == "__main__":
    num_features = 32
    num_labels = 16
    batch = 8

    key = jax.random.PRNGKey(0)
    kx, kw, kb, kx2 = jax.random.split(key, 4)

    # Deterministic parameter init (mimics nn.Linear's uniform(-1/sqrt(F), 1/sqrt(F)))
    bound = 1.0 / jnp.sqrt(jnp.float32(num_features))
    weight = jax.random.uniform(kw, (num_labels, num_features),
                                minval=-bound, maxval=bound, dtype=jnp.float32)
    bias = jax.random.uniform(kb, (num_labels,),
                              minval=-bound, maxval=bound, dtype=jnp.float32)
    x = jax.random.normal(kx, (batch, num_features), dtype=jnp.float32)

    model = MultiLabelModelPallas(weight, bias)
    # Force the Pallas path for the demo; auto-dispatch would (correctly) hand
    # a problem this tiny to fused XLA.
    out = jax.block_until_ready(model(x, use_pallas=True))
    ref = reference_forward(x, weight, bias)
    assert out.shape == (batch, num_labels)
    assert jnp.allclose(out, ref, atol=1e-5, rtol=1e-5)

    # Second shape: multi-block batch grid (exercises the megacore-splittable path).
    x2 = jax.random.normal(kx2, (64, num_features), dtype=jnp.float32)
    out2 = jax.block_until_ready(model(x2, use_pallas=True))
    ref2 = reference_forward(x2, weight, bias)
    assert out2.shape == (64, num_labels)
    assert jnp.allclose(out2, ref2, atol=1e-5, rtol=1e-5)

    print("KERNEL_OK")
</pallas_src>

<mosaic_0001>
module attributes {stable_mosaic.version = 11 : i64} {
  func.func @_multilabel_fused_kernel(%arg0: i32, %arg1: memref<8x32xf32, #tpu.memory_space<vmem>>, %arg2: memref<32x128xf32, #tpu.memory_space<vmem>>, %arg3: memref<1x128xf32, #tpu.memory_space<vmem>>, %arg4: memref<8x128xf32, #tpu.memory_space<vmem>>) attributes {dimension_semantics = [#tpu.dimension_semantics<parallel>], iteration_bounds = array<i64: 1>, scalar_prefetch = 0 : i64, scratch_operands = 0 : i64, tpu.core_type = #tpu.core_type<tc>, window_params = [{transform_indices = @transform_0, window_bounds = array<i64: 8, 32>}, {pipeline_mode = #tpu.pipeline_mode<synchronous>, transform_indices = @transform_1, window_bounds = array<i64: 32, 128>}, {pipeline_mode = #tpu.pipeline_mode<synchronous>, transform_indices = @transform_2, window_bounds = array<i64: 1, 128>}, {transform_indices = @transform_3, window_bounds = array<i64: 8, 128>}]} {
    %c0 = arith.constant 0 : index
    %c0_0 = arith.constant 0 : index
    %0 = vector.load %arg1[%c0, %c0_0] : memref<8x32xf32, #tpu.memory_space<vmem>>, vector<8x32xf32>
    %c0_1 = arith.constant 0 : index
    %c0_2 = arith.constant 0 : index
    %1 = vector.load %arg2[%c0_1, %c0_2] : memref<32x128xf32, #tpu.memory_space<vmem>>, vector<32x128xf32>
    %cst = arith.constant dense<0.000000e+00> : vector<8x128xf32>
    %2 = tpu.matmul %0, %1, %cst {dimension_numbers = #tpu.dot_dimension_numbers<[1], [0], [0], [1], [0, 0, 1, 1], [], []>} : vector<8x32xf32>, vector<32x128xf32>, vector<8x128xf32> -> vector<8x128xf32>
    %c0_3 = arith.constant 0 : index
    %c0_4 = arith.constant 0 : index
    %3 = vector.load %arg3[%c0_3, %c0_4] : memref<1x128xf32, #tpu.memory_space<vmem>>, vector<1x128xf32>
    %4 = vector.broadcast %3 : vector<1x128xf32> to vector<8x128xf32>
    %5 = arith.addf %2, %4 : vector<8x128xf32>
    %cst_5 = arith.constant 0.000000e+00 : f32
    %6 = vector.broadcast %cst_5 : f32 to vector<8x128xf32>
    %7 = arith.subf %6, %5 : vector<8x128xf32>
    %8 = math.exp %7 : vector<8x128xf32>
    %cst_6 = arith.constant 1.000000e+00 : f32
    %9 = vector.broadcast %cst_6 : f32 to vector<8x128xf32>
    %10 = arith.addf %9, %8 : vector<8x128xf32>
    %11 = tpu.reciprocal %10 : vector<8x128xf32> -> vector<8x128xf32>
    %c0_7 = arith.constant 0 : index
    %c0_8 = arith.constant 0 : index
    %12 = vector.load %arg4[%c0_7, %c0_8] : memref<8x128xf32, #tpu.memory_space<vmem>>, vector<8x128xf32>
    tpu.vector_store %arg4[%c0_7, %c0_8], %11 {strides = array<i32>} : memref<8x128xf32, #tpu.memory_space<vmem>>, vector<8x128xf32>,
    return
  }
  func.func @transform_0(%arg0: i32) -> (i32, i32) {
    %c0_i32 = arith.constant 0 : i32
    %c0_i32_0 = arith.constant 0 : i32
    return %arg0, %c0_i32 : i32, i32
  }
  func.func @transform_1(%arg0: i32) -> (i32, i32) {
    %c0_i32 = arith.constant 0 : i32
    %c0_i32_0 = arith.constant 0 : i32
    %c0_i32_1 = arith.constant 0 : i32
    return %c0_i32, %c0_i32_0 : i32, i32
  }
  func.func @transform_2(%arg0: i32) -> (i32, i32) {
    %c0_i32 = arith.constant 0 : i32
    %c0_i32_0 = arith.constant 0 : i32
    %c0_i32_1 = arith.constant 0 : i32
    return %c0_i32, %c0_i32_0 : i32, i32
  }
  func.func @transform_3(%arg0: i32) -> (i32, i32) {
    %c0_i32 = arith.constant 0 : i32
    %c0_i32_0 = arith.constant 0 : i32
    return %arg0, %c0_i32 : i32, i32
  }
}

</mosaic_0001>

<bundles_post_ra>
// kernel: tpu_custom_call.1
= control target key start
LH: loop header
LB: loop body
LE: loop exit
PB: predicated region body
PF: predicated region fallthrough
CT: control target
= control target key end

     0   :  { %8 = vsyncpa [#allocation3], 0  ;;  %s241_s0 = inlined_call_operand.hbm [shape: f32[8,32], index: 0, kind: input, shape index: {}]   ;;  %s242_s1 = inlined_call_operand.hbm [shape: f32[32,128], index: 1, kind: input, shape index: {}]   ;;  %s243_s2 = inlined_call_operand.vmem [shape: f32[1,128], index: 2, kind: input, shape index: {}]   ;;  %s244_s3 = inlined_call_operand.hbm [shape: f32[8,128], index: 3, kind: output, shape index: {}]  }
   0x1   :  { %9 = vsyncpa [#allocation6], 0 }
   0x2   :  { %10 = vsyncpa [#allocation4], 0  ;;  %s16_s14 = sshll.u32 %s241_s0, 4  ;;  %s204_s15 = smov [#allocation2]   ;;  %s17_s14 = int_to_ptr.hbm [resolvable:$true] %s16_s14 }
   0x3   :  { %s18_s16 = sshll.u32 %s204_s15, 4  ;;  %s26_s19 = sshll.u32 %s242_s1, 4  ;;  %s19_s16 = int_to_ptr.vmem [resolvable:$true] %s18_s16  ;;  %s27_s19 = int_to_ptr.hbm [resolvable:$true] %s26_s19 }
   0x4   :  { %21 = dma.hbm_to_vmem [thread:$0]  %s17_s14, 128, %s19_s16, [#allocation3]  }
   0x5   :  { %s205_s20 = smov [#allocation5]   ;;  %s206_s22 = smov 128  }
   0x6   :  { %s28_s21 = sshll.u32 %s205_s20, 4  ;;  %s207_s23 = smov 8   ;;  %s29_s21 = int_to_ptr.vmem [resolvable:$true] %s28_s21 }
   0x7   :  { %34 = dma.hbm_to_vmem [thread:$0]  %s27_s19, 512, %s29_s21, [#allocation6], %s206_s22, %s206_s22, %s207_s23  }
   0x8   :  { %198 = dma.done.wait [#allocation3], 128  }
   0x9   :  { %199 = vsyncadd [#allocation3], 4294967168 }
   0xa   :  { %200 = dma.done.wait [#allocation6], 512  }
   0xb   :  { %201 = vsyncadd [#allocation6], 4294966784  ;;  %v49_v0 = vld [vmem:[#allocation5 + $0x18] sm:$0xff]  ;;  %v48_v1 = vld [vmem:[#allocation5 + $0x10] sm:$0xff]  ;;  %vm54_vm0 = vcmask 261120   ;;  %s208_s24 = smov [#allocation7]  }
   0xc   :  { %70 = vmatpush.msra.mxu0 %v49_v0  ;;  %v47_v2 = vld [vmem:[#allocation5 + $0x8] sm:$0xff]  ;;  %v46_v3 = vld [vmem:[#allocation5] sm:$0xff]  ;;  %v45_v4 = vld [vmem:[#allocation2] sm:$0xff]  ;;  %s102_s25 = sshll.u32 %s208_s24, 4  ;;  %s103_s25 = int_to_ptr.vmem [resolvable:$true] %s102_s25 }
   0xd   :  { %v121_v5 = vld [vmem:[%s243_s2] ss:$0 sm:$0xff]  ;;  %s104_s2 = sshll.u32 %s244_s3, 4  ;;  %s105_s2 = int_to_ptr.hbm [resolvable:$true] %s104_s2 }
   0xe   :  { %71 = vmatpush.msra.mxu0 %v48_v1 }
  0x10   :  { %72 = vmatpush.msra.mxu0 %v47_v2 }
  0x12   :  { %73 = vmatpush.msra.mxu0 %v46_v3 }
  0x13   :  { %115 = vmatmul.msk.f32.vlgmr.msra.gmra.mxu0 %vm54_vm0, %v45_v4 }
  0x90   :  { %v75_v6 = vpop.f32.mrf.mxu0 }
  0x91   :  { %v76_v7 = vadd.f32 %v121_v5, %v75_v6 }
  0x93   :  { %v78_v8 = vsub.f32 0.0, %v76_v7 }
  0x95   :  { %v79_v9 = vmul.f32 1.442695, %v78_v8 }
  0x97   :  { %122 = vpow2.f32 %v79_v9 }
  0x9d   :  { %v123_v10 = vpop.eup %122 }
  0x9e   :  { %v81_v11 = vadd.f32 1.0, %v123_v10 }
  0xa0   :  { %124 = vrcp.f32 %v81_v11  ;;  %v93_v15 = vand.u32 2147483648, %v81_v11  ;;  %v91_v17 = vand.u32 2147483647, %v81_v11  ;;  %vm87_vm2 = vweird.f32 %v81_v11 }
  0xa2   :  { %v94_v19 = vor.u32 1.1754944e-38, %v93_v15  ;;  %vm92_vm4 = vcmp.eq.f32.partialorder %v91_v17, 8.507059e+37 }
  0xa6   :  { %v125_v12 = vpop.eup %124 }
  0xa7   :  { %v83_v13 = vmul.f32 %v125_v12, %v81_v11  ;;  %vm88_vm1 = vweird.f32 %v125_v12 }
  0xa8   :  { %vm89_vm3 = vmor %vm87_vm2, %vm88_vm1 }
  0xa9   :  { %v84_v14 = vsub.f32 1.0, %v83_v13 }
  0xab   :  { %v85_v16 = vmul.f32 %v125_v12, %v84_v14 }
  0xad   :  { %v86_v18 = vadd.f32 %v125_v12, %v85_v16 }
  0xaf   :  { %v90_v20 = vsel %vm89_vm3, %v125_v12, %v86_v18 }
  0xb0   :  { %v95_v21 = vsel %vm92_vm4, %v94_v19, %v90_v20 }
  0xb1   :  { %96 = vst [vmem:[#allocation7] sm:$0xff] %v95_v21 }
  0xb2   :  { %107 = dma.vmem_to_hbm [thread:$0]  %s103_s25, 128, %s105_s2, [#allocation4]  }
  0xb3   :  { %202 = dma.done.wait [#allocation4], 128  }
  0xb4   :  { %203 = vsyncadd [#allocation4], 4294967168 }
  0xb5   :  { %112 = vsyncpa [#allocation3], 1 }
  0xb6   :  { %113 = vsyncpa [#allocation6], 1 }
  0xb7   :  { %114 = vsyncpa [#allocation4], 1 }

</bundles_post_ra>
